<compile_context>
chip_gen: v6e
topology: v6e:2x2x1
jax: 0.10.0
libtpu: 0.0.40
codegen_flags: <defaults>
</compile_context>

<pallas_src>
import jax
import jax.numpy as jnp
from jax.experimental import pallas as pl
from jax.experimental.pallas import tpu as pltpu

IN_DIM = 122          # real input features
K_PAD = 128           # padded contraction dim
H = 128               # hidden width (value hidden 64 is zero-padded to 128)
POLICY_DIM = 23       # policy logits live in cols 0:23
VALUE_COL = 23        # pre-tanh value lives in col 23
OUT_W = 128           # lane-dense fused output width
BLOCK_B = 512         # large-batch tile (measured ~85% of HBM roofline)

# Weight-slab column layout: [ w1 (128x256) | w2 (256x256) | w3 (256x128) ]
W1_LO, W1_HI = 0, 2 * H
W2_LO, W2_HI = 2 * H, 4 * H
W3_LO, W3_HI = 4 * H, 4 * H + OUT_W
SLAB_COLS = W3_HI      # 640


# ---------------------------------------------------------------------------
# Kernel: whole network = 3 MXU dots, one lane-dense bf16 output tile
# ---------------------------------------------------------------------------
def _heads_kernel(x_ref, w_ref, bias_ref, out_ref):
    x = x_ref[...]                                     # [tb, 128] bf16

    # Static, 128-aligned views into the resident weight slab.
    w1 = w_ref[0:K_PAD, W1_LO:W1_HI]                   # [128, 256] bf16
    w2 = w_ref[:, W2_LO:W2_HI]                         # [256, 256] bf16 (block-diag)
    w3 = w_ref[:, W3_LO:W3_HI]                         # [256, 128] bf16

    b1 = bias_ref[0:1, :]                              # [1, 256] f32
    b2 = bias_ref[1:2, :]                              # [1, 256] f32
    b3 = bias_ref[2:3, :OUT_W]                         # [1, 128] f32

    # Layer 1, both heads fused along N: cols 0:128 policy, 128:256 value.
    h1 = jnp.maximum(jnp.dot(x, w1, preferred_element_type=jnp.float32) + b1, 0.0)

    # Layer 2, block-diagonal (policy 128x128 | value 128x64 zero-padded), K=256.
    h2 = jnp.maximum(
        jnp.dot(h1.astype(jnp.bfloat16), w2, preferred_element_type=jnp.float32) + b2,
        0.0)

    # Layer 3 fused into one lane-dense tile: cols 0:23 policy logits,
    # col 23 pre-tanh value (tanh applied in the wrapper).
    out = jnp.dot(h2.astype(jnp.bfloat16), w3, preferred_element_type=jnp.float32) + b3

    out_ref[...] = out.astype(out_ref.dtype)           # unmasked full-width bf16 store


# ---------------------------------------------------------------------------
# Parameter packing (done once, outside the hot path)
# Weights are stored as [in, out] (transposed vs torch), biases as [out].
# ---------------------------------------------------------------------------
def pack_params(p):
    f32, bf16 = jnp.float32, jnp.bfloat16

    # w1: [128, 256]; cols 0:128 policy layer-1, cols 128:256 value layer-1.
    w1 = jnp.zeros((K_PAD, 2 * H), f32)
    w1 = w1.at[:IN_DIM, :H].set(p["pw1"])
    w1 = w1.at[:IN_DIM, H:].set(p["vw1"])

    # w2: [256, 256] block-diagonal; upper-left = policy layer-2,
    # lower-right[:, :64] = value layer-2 (rest stays exactly zero).
    w2 = jnp.zeros((2 * H, 2 * H), f32)
    w2 = w2.at[:H, :H].set(p["pw2"])
    w2 = w2.at[H:, H:H + 64].set(p["vw2"])

    # w3: [256, 128]; rows 0:128 -> policy logits in cols 0:23,
    # rows 128:192 -> value scalar in col 23 (disjoint columns).
    w3 = jnp.zeros((2 * H, OUT_W), f32)
    w3 = w3.at[:H, :POLICY_DIM].set(p["pw3"])
    w3 = w3.at[H:H + 64, VALUE_COL:VALUE_COL + 1].set(p["vw3"])

    # One resident bf16 slab [256, 640]: w1 | w2 | w3.
    slab = jnp.zeros((2 * H, SLAB_COLS), f32)
    slab = slab.at[:K_PAD, W1_LO:W1_HI].set(w1)
    slab = slab.at[:, W2_LO:W2_HI].set(w2)
    slab = slab.at[:, W3_LO:W3_HI].set(w3)

    # All biases packed into one [8, 256] f32 array (one small DMA).
    bias = jnp.zeros((8, 2 * H), f32)
    bias = bias.at[0, :H].set(p["pb1"])
    bias = bias.at[0, H:].set(p["vb1"])
    bias = bias.at[1, :H].set(p["pb2"])
    bias = bias.at[1, H:H + 64].set(p["vb2"])
    bias = bias.at[2, :POLICY_DIM].set(p["pb3"])
    bias = bias.at[2, VALUE_COL].set(p["vb3"][0])

    return dict(w=slab.astype(bf16), bias=bias)


# ---------------------------------------------------------------------------
# Wrapper
# ---------------------------------------------------------------------------
def _pick_tile(B):
    # Bucketed small-batch tiles (bf16 sublane pack => multiples of 16) to avoid
    # recompiling per distinct B in inference loops.
    for tb in (16, 64, 128, 256):
        if B <= tb:
            return tb
    # Large batches: big tiles for HBM-roofline efficiency, but keep >= 2 grid
    # steps so the "parallel" batch axis shards across v7x's two TensorCores.
    if B <= 2 * 256:
        return 256
    return BLOCK_B


def neural_network_forward(x, packed):
    """x: [B, 122] float32. Returns (value [B,1] f32, policy [B,23] f32)."""
    B = x.shape[0]
    tb = _pick_tile(B)
    b_pad = pl.cdiv(B, tb) * tb
    grid = (b_pad // tb,)

    # Single fused pad+cast pass (bf16 halves kernel input HBM bytes).
    # TODO(synk): have the upstream producer emit bf16 [*,128] directly so this
    # extra HBM pass disappears entirely at large batch.
    x_pad = jnp.pad(x.astype(jnp.bfloat16),
                    ((0, b_pad - B), (0, K_PAD - IN_DIM)))

    out = pl.pallas_call(
        _heads_kernel,
        out_shape=jax.ShapeDtypeStruct((b_pad, OUT_W), jnp.bfloat16),
        grid=grid,
        in_specs=[
            pl.BlockSpec((tb, K_PAD), lambda i: (i, 0)),          # x tile
            pl.BlockSpec((2 * H, SLAB_COLS), lambda i: (0, 0)),   # weight slab (resident)
            pl.BlockSpec((8, 2 * H), lambda i: (0, 0)),           # biases (resident)
        ],
        out_specs=pl.BlockSpec((tb, OUT_W), lambda i: (i, 0)),
        compiler_params=pltpu.CompilerParams(dimension_semantics=("parallel",)),
    )(x_pad, packed["w"], packed["bias"])

    out = out[:B].astype(jnp.float32)
    policy = out[:, :POLICY_DIM]
    value = jnp.tanh(out[:, VALUE_COL:VALUE_COL + 1])   # tanh on 1 lane, in XLA
    return value, policy


# ---------------------------------------------------------------------------
# Deterministic parameter init (PyTorch nn.Linear-style U(-1/sqrt(fan_in), +))
# ---------------------------------------------------------------------------
def _init_linear(key, in_dim, out_dim):
    kw, kb = jax.random.split(key)
    bound = 1.0 / (in_dim ** 0.5)
    w = jax.random.uniform(kw, (in_dim, out_dim), jnp.float32, -bound, bound)
    b = jax.random.uniform(kb, (out_dim,), jnp.float32, -bound, bound)
    return w, b


def init_params(key):
    keys = jax.random.split(key, 6)
    pw1, pb1 = _init_linear(keys[0], 122, 128)
    pw2, pb2 = _init_linear(keys[1], 128, 128)
    pw3, pb3 = _init_linear(keys[2], 128, 23)
    vw1, vb1 = _init_linear(keys[3], 122, 128)
    vw2, vb2 = _init_linear(keys[4], 128, 64)
    vw3, vb3 = _init_linear(keys[5], 64, 1)
    return dict(
        pw1=pw1, pb1=pb1, pw2=pw2, pb2=pb2, pw3=pw3, pb3=pb3,
        vw1=vw1, vb1=vb1, vw2=vw2, vb2=vb2, vw3=vw3, vb3=vb3,
    )


# ---------------------------------------------------------------------------
# Pure-JAX reference with the same bf16 quantization as the kernel
# (bf16 activations/weights at dot inputs, f32 accumulation / bias / ReLU).
# ---------------------------------------------------------------------------
def _reference_forward(x, p):
    def qdot(a, w):
        return jnp.dot(a.astype(jnp.bfloat16), w.astype(jnp.bfloat16),
                       preferred_element_type=jnp.float32)
    h = jnp.maximum(qdot(x, p["pw1"]) + p["pb1"], 0.0)
    h = jnp.maximum(qdot(h, p["pw2"]) + p["pb2"], 0.0)
    policy = qdot(h, p["pw3"]) + p["pb3"]
    v = jnp.maximum(qdot(x, p["vw1"]) + p["vb1"], 0.0)
    v = jnp.maximum(qdot(v, p["vw2"]) + p["vb2"], 0.0)
    value = jnp.tanh(qdot(v, p["vw3"]) + p["vb3"])
    return value, policy


if __name__ == "__main__":
    key = jax.random.PRNGKey(0)
    k_params, k_x1, k_x2 = jax.random.split(key, 3)

    params = init_params(k_params)
    packed = pack_params(params)

    forward = jax.jit(neural_network_forward)

    # Small batch (single grid step, bucketed tile)
    batch = 8
    x = jax.random.normal(k_x1, (batch, IN_DIM), dtype=jnp.float32)
    value, policy = jax.block_until_ready(forward(x, packed))
    ref_value, ref_policy = _reference_forward(x, params)
    assert value.shape == (batch, 1) and policy.shape == (batch, POLICY_DIM)
    assert jnp.allclose(value, ref_value, atol=3e-2, rtol=3e-2)
    assert jnp.allclose(policy, ref_policy, atol=3e-2, rtol=3e-2)

    # Larger batch (exercises multi-step batch grid + padding path)
    batch2 = 300
    x2 = jax.random.normal(k_x2, (batch2, IN_DIM), dtype=jnp.float32)
    value2, policy2 = jax.block_until_ready(forward(x2, packed))
    ref_value2, ref_policy2 = _reference_forward(x2, params)
    assert value2.shape == (batch2, 1) and policy2.shape == (batch2, POLICY_DIM)
    assert jnp.allclose(value2, ref_value2, atol=3e-2, rtol=3e-2)
    assert jnp.allclose(policy2, ref_policy2, atol=3e-2, rtol=3e-2)

    print("KERNEL_OK")
</pallas_src>

<mosaic_0001>
module attributes {stable_mosaic.version = 11 : i64} {
  func.func @_heads_kernel(%arg0: i32, %arg1: memref<16x128xbf16, #tpu.memory_space<vmem>>, %arg2: memref<256x640xbf16, #tpu.memory_space<vmem>>, %arg3: memref<8x256xf32, #tpu.memory_space<vmem>>, %arg4: memref<16x128xbf16, #tpu.memory_space<vmem>>) attributes {dimension_semantics = [#tpu.dimension_semantics<parallel>], iteration_bounds = array<i64: 1>, scalar_prefetch = 0 : i64, scratch_operands = 0 : i64, tpu.core_type = #tpu.core_type<tc>, window_params = [{transform_indices = @transform_0, window_bounds = array<i64: 16, 128>}, {pipeline_mode = #tpu.pipeline_mode<synchronous>, transform_indices = @transform_1, window_bounds = array<i64: 256, 640>}, {pipeline_mode = #tpu.pipeline_mode<synchronous>, transform_indices = @transform_2, window_bounds = array<i64: 8, 256>}, {transform_indices = @transform_3, window_bounds = array<i64: 16, 128>}]} {
    %c0 = arith.constant 0 : index
    %c0_0 = arith.constant 0 : index
    %0 = vector.load %arg1[%c0, %c0_0] : memref<16x128xbf16, #tpu.memory_space<vmem>>, vector<16x128xbf16>
    %c0_1 = arith.constant 0 : index
    %c0_2 = arith.constant 0 : index
    %1 = vector.load %arg2[%c0_1, %c0_2] : memref<256x640xbf16, #tpu.memory_space<vmem>>, vector<128x256xbf16>
    %c0_3 = arith.constant 0 : index
    %c256 = arith.constant 256 : index
    %2 = vector.load %arg2[%c0_3, %c256] : memref<256x640xbf16, #tpu.memory_space<vmem>>, vector<256x256xbf16>
    %c0_4 = arith.constant 0 : index
    %c512 = arith.constant 512 : index
    %3 = vector.load %arg2[%c0_4, %c512] : memref<256x640xbf16, #tpu.memory_space<vmem>>, vector<256x128xbf16>
    %c0_5 = arith.constant 0 : index
    %c0_6 = arith.constant 0 : index
    %4 = vector.load %arg3[%c0_5, %c0_6] : memref<8x256xf32, #tpu.memory_space<vmem>>, vector<1x256xf32>
    %c1 = arith.constant 1 : index
    %c0_7 = arith.constant 0 : index
    %5 = vector.load %arg3[%c1, %c0_7] : memref<8x256xf32, #tpu.memory_space<vmem>>, vector<1x256xf32>
    %c2 = arith.constant 2 : index
    %c0_8 = arith.constant 0 : index
    %6 = vector.load %arg3[%c2, %c0_8] : memref<8x256xf32, #tpu.memory_space<vmem>>, vector<1x128xf32>
    %cst = arith.constant dense<0.000000e+00> : vector<16x256xf32>
    %7 = tpu.matmul %0, %1, %cst {dimension_numbers = #tpu.dot_dimension_numbers<[1], [0], [0], [1], [0, 0, 1, 1], [], []>} : vector<16x128xbf16>, vector<128x256xbf16>, vector<16x256xf32> -> vector<16x256xf32>
    %8 = vector.broadcast %4 : vector<1x256xf32> to vector<16x256xf32>
    %9 = arith.addf %7, %8 : vector<16x256xf32>
    %cst_9 = arith.constant 0.000000e+00 : f32
    %10 = vector.broadcast %cst_9 : f32 to vector<16x256xf32>
    %11 = arith.maximumf %9, %10 : vector<16x256xf32>
    %12 = arith.truncf %11 : vector<16x256xf32> to vector<16x256xbf16>
    %cst_10 = arith.constant dense<0.000000e+00> : vector<16x256xf32>
    %13 = tpu.matmul %12, %2, %cst_10 {dimension_numbers = #tpu.dot_dimension_numbers<[1], [0], [0], [1], [0, 0, 1, 1], [], []>} : vector<16x256xbf16>, vector<256x256xbf16>, vector<16x256xf32> -> vector<16x256xf32>
    %14 = vector.broadcast %5 : vector<1x256xf32> to vector<16x256xf32>
    %15 = arith.addf %13, %14 : vector<16x256xf32>
    %cst_11 = arith.constant 0.000000e+00 : f32
    %16 = vector.broadcast %cst_11 : f32 to vector<16x256xf32>
    %17 = arith.maximumf %15, %16 : vector<16x256xf32>
    %18 = arith.truncf %17 : vector<16x256xf32> to vector<16x256xbf16>
    %cst_12 = arith.constant dense<0.000000e+00> : vector<16x128xf32>
    %19 = tpu.matmul %18, %3, %cst_12 {dimension_numbers = #tpu.dot_dimension_numbers<[1], [0], [0], [1], [0, 0, 1, 1], [], []>} : vector<16x256xbf16>, vector<256x128xbf16>, vector<16x128xf32> -> vector<16x128xf32>
    %20 = vector.broadcast %6 : vector<1x128xf32> to vector<16x128xf32>
    %21 = arith.addf %19, %20 : vector<16x128xf32>
    %22 = arith.truncf %21 : vector<16x128xf32> to vector<16x128xbf16>
    %c0_13 = arith.constant 0 : index
    %c0_14 = arith.constant 0 : index
    %23 = vector.load %arg4[%c0_13, %c0_14] : memref<16x128xbf16, #tpu.memory_space<vmem>>, vector<16x128xbf16>
    tpu.vector_store %arg4[%c0_13, %c0_14], %22 {strides = array<i32>} : memref<16x128xbf16, #tpu.memory_space<vmem>>, vector<16x128xbf16>,
    return
  }
  func.func @transform_0(%arg0: i32) -> (i32, i32) {
    %c0_i32 = arith.constant 0 : i32
    %c0_i32_0 = arith.constant 0 : i32
    return %arg0, %c0_i32 : i32, i32
  }
  func.func @transform_1(%arg0: i32) -> (i32, i32) {
    %c0_i32 = arith.constant 0 : i32
    %c0_i32_0 = arith.constant 0 : i32
    %c0_i32_1 = arith.constant 0 : i32
    return %c0_i32, %c0_i32_0 : i32, i32
  }
  func.func @transform_2(%arg0: i32) -> (i32, i32) {
    %c0_i32 = arith.constant 0 : i32
    %c0_i32_0 = arith.constant 0 : i32
    %c0_i32_1 = arith.constant 0 : i32
    return %c0_i32, %c0_i32_0 : i32, i32
  }
  func.func @transform_3(%arg0: i32) -> (i32, i32) {
    %c0_i32 = arith.constant 0 : i32
    %c0_i32_0 = arith.constant 0 : i32
    return %arg0, %c0_i32 : i32, i32
  }
}

</mosaic_0001>

<bundles_post_ra>
// kernel: neural_network_forward.1
= control target key start
LH: loop header
LB: loop body
LE: loop exit
PB: predicated region body
PF: predicated region fallthrough
CT: control target
= control target key end

     0   :  { %8 = vsyncpa [#allocation3], 0  ;;  %s845_s12 = smov [#allocation2]   ;;  %s887_s0 = inlined_call_operand.vmem [shape: bf16[16,128], index: 0, kind: input, shape index: {}]   ;;  %s888_s1 = inlined_call_operand.hbm [shape: bf16[256,640], index: 1, kind: input, shape index: {}]   ;;  %s889_s2 = inlined_call_operand.vmem [shape: f32[8,256], index: 2, kind: input, shape index: {}]   ;;  %s890_s3 = inlined_call_operand.vmem [shape: bf16[16,128], index: 3, kind: output, shape index: {}]  }
   0x1   :  { %s16_s13 = sshll.u32 %s845_s12, 4  ;;  %s17_s13 = int_to_ptr.vmem [resolvable:$true] %s16_s13 }
   0x2   :  { %s831_s14 = scalar_lea.vmem %s17_s13, 10240  ;;  %p836_p1 = scmp.lt.s32.totalorder %s17_s13, %s17_s13 }
   0x3   :  { %p832_p0 = scmp.ne.s32.totalorder %s17_s13, %s831_s14  ;;  %p837_p2 = scmp.lt.s32.totalorder %s831_s14, %s831_s14 }
   0x5   :  { %p838_p3 = por %p837_p2, %p836_p1 }
   0x7   :  { %p839_p4 = pnand %p838_p3, %p832_p0 }
   0x9   :  { %842 = shalt.err (!%p839_p4)
}
   0xa   :  { %s846_s15 = smov 320   ;;  %s847_s16 = smov 20  }
   0xb   :  { %22 = dma.hbm_to_vmem [thread:$0]  %s888_s1, 10240, %s17_s13, [#allocation3], %s846_s15, %s846_s15, %s847_s16  }
   0xc   :  { %843 = dma.done.wait [#allocation3], 10240  }
   0xd   :  { %844 = vsyncadd [#allocation3], 4294957056  ;;  %v848_v0 = vmov 0   ;;  %v734_v1 = vld [vmem:[#allocation2 + $0x11c] ss:$20 sps:$4 sm:$0xff]   ;;  %v758_v27 = vld [vmem:[%s887_s0] sm:$0xff]   ;;  %v116_v60 = vlaneseq }
   0xe   :  { %244 = vmatprep.mubr.bf16.mxu0 %v848_v0  ;;  %v736_v2 = vld [vmem:[#allocation2 + $0x118] ss:$20 sps:$4 sm:$0xff]   ;;  %212 = vmatprep.subr.bf16.mxu0 %v734_v1  ;;  %v737_v3 = vld [vmem:[#allocation2 + $0xf4] ss:$20 sps:$4 sm:$0xff]   ;;  %v739_v4 = vld [vmem:[#allocation2 + $0xf0] ss:$20 sps:$4 sm:$0xff]  }
   0xf   :  { %213 = vmatpush1.bf16.msra.mxu0 %v736_v2  ;;  %v740_v5 = vld [vmem:[#allocation2 + $0xcc] ss:$20 sps:$4 sm:$0xff]   ;;  %v742_v6 = vld [vmem:[#allocation2 + $0xc8] ss:$20 sps:$4 sm:$0xff]   ;;  %v743_v7 = vld [vmem:[#allocation2 + $0xa4] ss:$20 sps:$4 sm:$0xff]  }
  0x10   :  { %214 = vmatprep.subr.bf16.mxu0 %v737_v3  ;;  %v745_v8 = vld [vmem:[#allocation2 + $0xa0] ss:$20 sps:$4 sm:$0xff]   ;;  %v746_v9 = vld [vmem:[#allocation2 + $0x7c] ss:$20 sps:$4 sm:$0xff]   ;;  %v759_v10 = vld [vmem:[#allocation2 + $0x124] ss:$20 sps:$4 sm:$0xff]  }
  0x11   :  { %v761_v11 = vld [vmem:[#allocation2 + $0x120] ss:$20 sps:$4 sm:$0xff]   ;;  %v762_v12 = vld [vmem:[#allocation2 + $0xfc] ss:$20 sps:$4 sm:$0xff]   ;;  %432 = vmatprep.subr.bf16.mxu1 %v759_v10  ;;  %v748_v13 = vld [vmem:[#allocation2 + $0x78] ss:$20 sps:$4 sm:$0xff]  }
  0x12   :  { %433 = vmatpush1.bf16.msra.mxu1 %v761_v11  ;;  %v764_v14 = vld [vmem:[#allocation2 + $0xf8] ss:$20 sps:$4 sm:$0xff]   ;;  %v749_v15 = vld [vmem:[#allocation2 + $0x54] ss:$20 sps:$4 sm:$0xff]   ;;  %v751_v17 = vld [vmem:[#allocation2 + $0x50] ss:$20 sps:$4 sm:$0xff]  }
  0x13   :  { %215 = vmatpush1.bf16.msra.mxu0 %v739_v4  ;;  %434 = vmatprep.subr.bf16.mxu1 %v762_v12  ;;  %v765_v16 = vld [vmem:[#allocation2 + $0xd4] ss:$20 sps:$4 sm:$0xff]   ;;  %v767_v18 = vld [vmem:[#allocation2 + $0xd0] ss:$20 sps:$4 sm:$0xff]   ;;  %v752_v19 = vld [vmem:[#allocation2 + $0x2c] ss:$20 sps:$4 sm:$0xff]  }
  0x14   :  { %216 = vmatprep.subr.bf16.mxu0 %v740_v5  ;;  %v768_v20 = vld [vmem:[#allocation2 + $0xac] ss:$20 sps:$4 sm:$0xff]   ;;  %v754_v21 = vld [vmem:[#allocation2 + $0x28] ss:$20 sps:$4 sm:$0xff]   ;;  %v755_v23 = vld [vmem:[#allocation2 + $0x4] ss:$20 sps:$4 sm:$0xff]  }
  0x15   :  { %v770_v22 = vld [vmem:[#allocation2 + $0xa8] ss:$20 sps:$4 sm:$0xff]   ;;  %v771_v24 = vld [vmem:[#allocation2 + $0x84] ss:$20 sps:$4 sm:$0xff]   ;;  %v757_v25 = vld [vmem:[#allocation2] ss:$20 sps:$4 sm:$0xff]  }
  0x16   :  { %435 = vmatpush1.bf16.msra.mxu1 %v764_v14  ;;  %v773_v26 = vld [vmem:[#allocation2 + $0x80] ss:$20 sps:$4 sm:$0xff]   ;;  %v774_v28 = vld [vmem:[#allocation2 + $0x5c] ss:$20 sps:$4 sm:$0xff]   ;;  %v776_v29 = vld [vmem:[#allocation2 + $0x58] ss:$20 sps:$4 sm:$0xff]  }
  0x17   :  { %217 = vmatpush1.bf16.msra.mxu0 %v742_v6  ;;  %436 = vmatprep.subr.bf16.mxu1 %v765_v16  ;;  %v777_v30 = vld [vmem:[#allocation2 + $0x34] ss:$20 sps:$4 sm:$0xff]   ;;  %v779_v31 = vld [vmem:[#allocation2 + $0x30] ss:$20 sps:$4 sm:$0xff]   ;;  %v780_v32 = vld [vmem:[#allocation2 + $0xc] ss:$20 sps:$4 sm:$0xff]  }
  0x18   :  { %218 = vmatprep.subr.bf16.mxu0 %v743_v7  ;;  %v782_v33 = vld [vmem:[#allocation2 + $0x8] ss:$20 sps:$4 sm:$0xff]   ;;  %v783_v34 = vld [vmem:[#allocation2 + $0x264] ss:$20 sps:$4 sm:$0xff]   ;;  %v785_v35 = vld [vmem:[#allocation2 + $0x260] ss:$20 sps:$4 sm:$0xff]  }
  0x19   :  { %v786_v36 = vld [vmem:[#allocation2 + $0x23c] ss:$20 sps:$4 sm:$0xff]   ;;  %v788_v37 = vld [vmem:[#allocation2 + $0x238] ss:$20 sps:$4 sm:$0xff]   ;;  %v789_v38 = vld [vmem:[#allocation2 + $0x214] ss:$20 sps:$4 sm:$0xff]  }
  0x1a   :  { %437 = vmatpush1.bf16.msra.mxu1 %v767_v18  ;;  %v791_v39 = vld [vmem:[#allocation2 + $0x210] ss:$20 sps:$4 sm:$0xff]   ;;  %v792_v40 = vld [vmem:[#allocation2 + $0x1ec] ss:$20 sps:$4 sm:$0xff]   ;;  %v794_v41 = vld [vmem:[#allocation2 + $0x1e8] ss:$20 sps:$4 sm:$0xff]  }
  0x1b   :  { %219 = vmatpush1.bf16.msra.mxu0 %v745_v8  ;;  %438 = vmatprep.subr.bf16.mxu1 %v768_v20  ;;  %v795_v42 = vld [vmem:[#allocation2 + $0x1c4] ss:$20 sps:$4 sm:$0xff]   ;;  %v797_v43 = vld [vmem:[#allocation2 + $0x1c0] ss:$20 sps:$4 sm:$0xff]   ;;  %v798_v44 = vld [vmem:[#allocation2 + $0x19c] ss:$20 sps:$4 sm:$0xff]  }
  0x1c   :  { %220 = vmatprep.subr.bf16.mxu0 %v746_v9  ;;  %v800_v45 = vld [vmem:[#allocation2 + $0x198] ss:$20 sps:$4 sm:$0xff]   ;;  %v801_v46 = vld [vmem:[#allocation2 + $0x174] ss:$20 sps:$4 sm:$0xff]   ;;  %v803_v47 = vld [vmem:[#allocation2 + $0x170] ss:$20 sps:$4 sm:$0xff]  }
  0x1d   :  { %v804_v48 = vld [vmem:[#allocation2 + $0x14c] ss:$20 sps:$4 sm:$0xff]   ;;  %v806_v49 = vld [vmem:[#allocation2 + $0x148] ss:$20 sps:$4 sm:$0xff]   ;;  %v813_v56 = vld [vmem:[#allocation2 + $0x1f0] ss:$20 sps:$4 sm:$0xff]  }
  0x1e   :  { %439 = vmatpush1.bf16.msra.mxu1 %v770_v22  ;;  %v807_v50 = vld [vmem:[#allocation2 + $0x268] ss:$20 sps:$4 sm:$0xff]   ;;  %v809_v52 = vld [vmem:[#allocation2 + $0x240] ss:$20 sps:$4 sm:$0xff]   ;;  %v811_v54 = vld [vmem:[#allocation2 + $0x218] ss:$20 sps:$4 sm:$0xff]  }
  0x1f   :  { %221 = vmatpush1.bf16.msra.mxu0 %v748_v13  ;;  %440 = vmatprep.subr.bf16.mxu1 %v771_v24  ;;  %v808_v51 = vld [vmem:[#allocation2 + $0x128] ss:$20 sps:$4 sm:$0xff]   ;;  %v810_v53 = vld [vmem:[#allocation2 + $0x100] ss:$20 sps:$4 sm:$0xff]   ;;  %v812_v55 = vld [vmem:[#allocation2 + $0xd8] ss:$20 sps:$4 sm:$0xff]  }
  0x20   :  { %222 = vmatprep.subr.bf16.mxu0 %v749_v15  ;;  %v814_v57 = vld [vmem:[#allocation2 + $0xb0] ss:$20 sps:$4 sm:$0xff]   ;;  %v815_v58 = vld [vmem:[#allocation2 + $0x1c8] ss:$20 sps:$4 sm:$0xff]   ;;  %v117_v61 = vshrl.u32 %v116_v60, 7 }
  0x21   :  { %v816_v59 = vld [vmem:[#allocation2 + $0x88] ss:$20 sps:$4 sm:$0xff]   ;;  %v818_v18 = vld [vmem:[#allocation2 + $0x60] ss:$20 sps:$4 sm:$0xff]   ;;  %v820_v20 = vld [vmem:[#allocation2 + $0x38] ss:$20 sps:$4 sm:$0xff]  }
  0x22   :  { %441 = vmatpush1.bf16.msra.mxu1 %v773_v26  ;;  %v122_v62 = vsub.s32 1, %v117_v61  ;;  %v118_v63 = vsub.s32 0, %v117_v61  ;;  %v111_v0 = vld [vmem:[%s889_s2] ss:$8 sm:$0x3] }
  0x23   :  { %223 = vmatpush1.bf16.msra.mxu0 %v751_v17  ;;  %442 = vmatprep.subr.bf16.mxu1 %v774_v28  ;;  %v817_v17 = vld [vmem:[#allocation2 + $0x1a0] ss:$20 sps:$4 sm:$0xff]   ;;  %v822_v22 = vld [vmem:[#allocation2 + $0x10] ss:$20 sps:$4 sm:$0xff]  }
  0x24   :  { %224 = vmatprep.subr.bf16.mxu0 %v752_v19  ;;  %v123_v2 = vrot.slane %v111_v0, %v122_v62  ;;  %v119_v3 = vrot.slane %v111_v0, %v118_v63  ;;  %v819_v19 = vld [vmem:[#allocation2 + $0x178] ss:$20 sps:$4 sm:$0xff]  }
  0x26   :  { %443 = vmatpush1.bf16.msra.mxu1 %v776_v29 }
  0x27   :  { %225 = vmatpush1.bf16.msra.mxu0 %v754_v21  ;;  %444 = vmatprep.subr.bf16.mxu1 %v777_v30  ;;  %v821_v21 = vld [vmem:[#allocation2 + $0x150] ss:$20 sps:$4 sm:$0xff]  }
  0x28   :  { %226 = vmatprep.subr.bf16.mxu0 %v755_v23  ;;  %v633_v23 = vld [vmem:[%s889_s2 + $0x1] ss:$8 sm:$0x3] }
  0x29   :  { %v265_v26 = vrot.slane %v633_v23, %v118_v63 }
  0x2a   :  { %445 = vmatpush1.bf16.msra.mxu1 %v779_v31 }
  0x2b   :  { %227 = vmatpush1.bf16.msra.mxu0 %v757_v25  ;;  %446 = vmatprep.subr.bf16.mxu1 %v780_v32  ;;  %v269_v25 = vrot.slane %v633_v23, %v122_v62 }
  0x2c   :  { %708 = vmatprep.subr.bf16.mxu0 %v807_v50 }
  0x2e   :  { %245 = vmatmul.mubr.bf16.vlgmr.msra.gmra.mxu0 %v758_v27  ;;  %447 = vmatpush1.bf16.msra.mxu1 %v782_v33 }
  0x2f   :  { %448 = vmatprep.subr.bf16.mxu1 %v783_v34  ;;  %709 = vmatpush3.bf16.msra.mxu0 %v808_v51 }
  0x30   :  { %710 = vmatprep.subr.bf16.mxu0 %v809_v52 }
  0x32   :  { %449 = vmatpush2.bf16.msra.mxu1 %v785_v35 }
  0x33   :  { %450 = vmatprep.subr.bf16.mxu1 %v786_v36  ;;  %711 = vmatpush3.bf16.msra.mxu0 %v810_v53 }
  0x34   :  { %712 = vmatprep.subr.bf16.mxu0 %v811_v54 }
  0x36   :  { %451 = vmatpush2.bf16.msra.mxu1 %v788_v37 }
  0x37   :  { %452 = vmatprep.subr.bf16.mxu1 %v789_v38  ;;  %713 = vmatpush3.bf16.msra.mxu0 %v812_v55 }
  0x38   :  { %714 = vmatprep.subr.bf16.mxu0 %v813_v56 }
  0x3a   :  { %453 = vmatpush2.bf16.msra.mxu1 %v791_v39 }
  0x3b   :  { %454 = vmatprep.subr.bf16.mxu1 %v792_v40  ;;  %715 = vmatpush3.bf16.msra.mxu0 %v814_v57 }
  0x3c   :  { %716 = vmatprep.subr.bf16.mxu0 %v815_v58 }
  0x3e   :  { %455 = vmatpush2.bf16.msra.mxu1 %v794_v41 }
  0x3f   :  { %456 = vmatprep.subr.bf16.mxu1 %v795_v42  ;;  %717 = vmatpush3.bf16.msra.mxu0 %v816_v59 }
  0x40   :  { %718 = vmatprep.subr.bf16.mxu0 %v817_v17 }
  0x42   :  { %457 = vmatpush2.bf16.msra.mxu1 %v797_v43 }
  0x43   :  { %458 = vmatprep.subr.bf16.mxu1 %v798_v44  ;;  %719 = vmatpush3.bf16.msra.mxu0 %v818_v18  ;;  %v114_v44 = vld [vmem:[%s889_s2 + $0x2] ss:$0 sm:$0xff] }
  0x44   :  { %720 = vmatprep.subr.bf16.mxu0 %v819_v19 }
  0x46   :  { %459 = vmatpush2.bf16.msra.mxu1 %v800_v45 }
  0x47   :  { %460 = vmatprep.subr.bf16.mxu1 %v801_v46  ;;  %721 = vmatpush3.bf16.msra.mxu0 %v820_v20 }
  0x48   :  { %722 = vmatprep.subr.bf16.mxu0 %v821_v21 }
  0x4a   :  { %461 = vmatpush2.bf16.msra.mxu1 %v803_v47 }
  0x4b   :  { %462 = vmatprep.subr.bf16.mxu1 %v804_v48  ;;  %723 = vmatpush3.bf16.msra.mxu0 %v822_v22 }
  0x4e   :  { %463 = vmatpush2.bf16.msra.mxu1 %v806_v49 }
  0xee   :  { %v246_v1 = vpop.f32.mrf.mxu0 }
  0xef   :  { %v247_v8 = vadd.f32 %v246_v1, %v119_v3 }
  0xf0   :  { %v248_v4 = vpop.f32.mrf.mxu0 }
  0xf1   :  { %v249_v6 = vadd.f32 %v248_v4, %v123_v2  ;;  %v255_v14 = vmax.f32 %v247_v8, 0.0 }
  0xf2   :  { %v250_v5 = vpop.f32.mrf.mxu0 }
  0xf3   :  { %v251_v7 = vadd.f32 %v250_v5, %v119_v3  ;;  %v256_v12 = vmax.f32 %v249_v6, 0.0 }
  0xf4   :  { %v252_v9 = vpop.f32.mrf.mxu0 }
  0xf5   :  { %v253_v10 = vadd.f32 %v252_v9, %v123_v2  ;;  %v257_v11 = vmax.f32 %v251_v7, 0.0 }
  0xf7   :  { %v258_v13 = vmax.f32 %v253_v10, 0.0  ;;  %v259_v16 = vpack.c.bf16 %v257_v11, %v255_v14 }
  0xf9   :  { %v260_v15 = vpack.c.bf16 %v258_v13, %v256_v12 }
  0xfb   :  { %464 = vmatprep.mubr.bf16.mxu1 %v260_v15 }
  0xfc   :  { %465 = vmatmul.mubr.bf16.vlgmr.msra.gmra.mxu1 %v259_v16 }
 0x1bc   :  { %v466_v24 = vpop.f32.mrf.mxu1 }
 0x1bd   :  { %v467_v31 = vadd.f32 %v466_v24, %v265_v26 }
 0x1be   :  { %v468_v27 = vpop.f32.mrf.mxu1 }
 0x1bf   :  { %v469_v29 = vadd.f32 %v468_v27, %v269_v25  ;;  %v475_v37 = vmax.f32 %v467_v31, 0.0 }
 0x1c0   :  { %v470_v28 = vpop.f32.mrf.mxu1 }
 0x1c1   :  { %v471_v30 = vadd.f32 %v470_v28, %v265_v26  ;;  %v476_v35 = vmax.f32 %v469_v29, 0.0 }
 0x1c2   :  { %v472_v32 = vpop.f32.mrf.mxu1 }
 0x1c3   :  { %v473_v33 = vadd.f32 %v472_v32, %v269_v25  ;;  %v477_v34 = vmax.f32 %v471_v30, 0.0 }
 0x1c5   :  { %v478_v36 = vmax.f32 %v473_v33, 0.0  ;;  %v479_v39 = vpack.c.bf16 %v477_v34, %v475_v37 }
 0x1c7   :  { %v480_v38 = vpack.c.bf16 %v478_v36, %v476_v35 }
 0x1c9   :  { %609 = vmatprep.mubr.bf16.mxu0 %v480_v38 }
 0x1ca   :  { %610 = vmatmul.mubr.bf16.vlgmr.msra.gmra.mxu0 %v479_v39 }
 0x28a   :  { %v724_v40 = vpop.f32.mrf.mxu0 }
 0x28c   :  { %v725_v41 = vpop.f32.mrf.mxu0 }
 0x28d   :  { %v726_v43 = vadd.f32 %v725_v41, %v724_v40 }
 0x28e   :  { %v727_v42 = vpop.f32.mrf.mxu0 }
 0x28f   :  { %v612_v47 = vadd.f32 %v726_v43, %v114_v44 }
 0x290   :  { %v728_v45 = vpop.f32.mrf.mxu0 }
 0x291   :  { %v729_v46 = vadd.f32 %v728_v45, %v727_v42 }
 0x293   :  { %v615_v48 = vadd.f32 %v729_v46, %v114_v44 }
 0x295   :  { %v706_v49 = vpack.c.bf16 %v615_v48, %v612_v47 }
 0x297   :  { %707 = vst [vmem:[%s890_s3] sm:$0xff] %v706_v49  }
 0x298   :  { %632 = vsyncpa [#allocation3], 1 }

</bundles_post_ra>
